<compile_context>
chip_gen: v5e
topology: v5e:2x2
jax: 0.10.0
libtpu: 0.0.40
codegen_flags: <defaults>
</compile_context>

<pallas_src>
import functools

import jax
import jax.numpy as jnp
from jax import lax
from jax.experimental import pallas as pl
from jax.experimental.pallas import tpu as pltpu

LANES = 128
SUBLANES = 8
CHUNK_ROWS = 128        # inner sub-chunk: (128,128) f32 = 64 KiB per live temporary
MAX_BLOCK_ROWS = 2048   # pipelined tile: (2048,128) f32 = 1 MiB; 2 in x 2 buf ~ 3-4 MiB VMEM
NEG_PAD = -30000.0      # neutral logit pad: exp(-|x|)=0, ce=0, base=0 (finite even in f16)


def _round_up(x, m):
    return ((x + m - 1) // m) * m


def _num_tensorcores():
    """1 on single-TC chips (v5e/v6e); 2 where a second TensorCore exists (v7x)."""
    try:
        info = pltpu.get_tpu_info()
        for attr in ("num_cores", "core_count", "num_tensorcores"):
            v = getattr(info, attr, None)
            if isinstance(v, int) and v > 0:
                return max(1, min(2, v))
    except Exception:
        pass
    try:
        if "v7" in jax.devices()[0].device_kind.lower():
            return 2
    except Exception:
        pass
    return 1


def _focal_partial_kernel(gamma, block_rows, chunk_rows, pred_ref, true_ref, acc_ref):
    num_chunks = block_rows // chunk_rows
    gamma_f = float(gamma)

    def fold(v):
        # (chunk_rows, 128) -> (8, 128): pure vreg-wise VPU adds; the cross-lane
        # reduction is deferred to the JAX glue (also more accurate for huge n).
        return jnp.sum(v.reshape(chunk_rows // SUBLANES, SUBLANES, LANES), axis=0)

    def chunk_body(c, carry):
        s_t, s_tb, s_b = carry
        r0 = pl.multiple_of(c * chunk_rows, chunk_rows)
        x = pred_ref[pl.ds(r0, chunk_rows), :].astype(jnp.float32)
        t = true_ref[pl.ds(r0, chunk_rows), :].astype(jnp.float32)

        # One exp per element feeds both the stable BCE and the sigmoid.
        #   e  = exp(-|x|)
        #   ce = max(x,0) - x*t + log1p(e)
        #   p  = 1/(1+e) if x>=0 else e/(1+e)
        e = jnp.exp(-jnp.abs(x))
        ce = jnp.maximum(x, 0.0) - x * t + jnp.log1p(e)
        r = pl.reciprocal(1.0 + e, approx=True)   # EUP only; tiny relative error in p
        p = jnp.where(x >= 0.0, r, e * r)

        pt = p * t
        one_m_pt = p + t - 2.0 * pt                # == t*(1-p) + (1-t)*p == 1 - p_t
        if gamma_f == 2.0:                         # module default: plain VPU multiply
            focal = one_m_pt * one_m_pt
        elif gamma_f == 1.0:
            focal = one_m_pt
        elif gamma_f == 0.0:
            focal = jnp.ones_like(one_m_pt)
        else:
            focal = one_m_pt ** gamma_f
        base = ce * focal

        return (s_t + fold(t), s_tb + fold(t * base), s_b + fold(base))

    zero = jnp.zeros((SUBLANES, LANES), jnp.float32)
    s_t, s_tb, s_b = lax.fori_loop(0, num_chunks, chunk_body, (zero, zero, zero),
                                   unroll=(num_chunks <= 8))

    @pl.when(pl.program_id(1) == 0)
    def _():
        acc_ref[...] = jnp.zeros_like(acc_ref)

    acc_ref[0, :, :] += s_t      # sum(t)
    acc_ref[1, :, :] += s_tb     # sum(t * base)
    acc_ref[2, :, :] += s_b      # sum(base)


def focal_loss(y_pred, y_true, gamma=2.0):
    """Pallas-TPU implementation of FocalLoss(gamma).forward(y_pred, y_true)."""
    assert y_pred.shape == y_true.shape
    n = y_pred.size

    xf = y_pred.reshape(-1)   # native dtypes; kernel upcasts to f32
    tf = y_true.reshape(-1)

    # Row alignment follows the narrowest input dtype's sublane packing
    # (8 for 32-bit, 16 for bf16, 32 for int8), avoiding partial-sublane blocks.
    min_item = max(1, min(y_pred.dtype.itemsize, y_true.dtype.itemsize))
    row_align = SUBLANES * max(1, 4 // min_item)

    rows = pl.cdiv(n, LANES)
    num_shards = min(_num_tensorcores(), max(1, rows // (2 * CHUNK_ROWS)))
    rows_per_shard = pl.cdiv(rows, num_shards)

    if rows_per_shard <= CHUNK_ROWS:
        steps = 1
        block_rows = max(row_align, _round_up(rows_per_shard, row_align))
        chunk_rows = block_rows
    else:
        steps = pl.cdiv(rows_per_shard, MAX_BLOCK_ROWS)
        block_rows = min(MAX_BLOCK_ROWS,
                         _round_up(pl.cdiv(rows_per_shard, steps), CHUNK_ROWS))
        steps = pl.cdiv(rows_per_shard, block_rows)
        chunk_rows = CHUNK_ROWS

    padded_rows = num_shards * steps * block_rows
    pad = padded_rows * LANES - n
    if pad:
        # Neutral padding (x << 0, t = 0): ce=0, base=0, t=0 -> zero contribution,
        # so no in-kernel mask is needed.  Only materialized when tiling requires it.
        xf = jnp.pad(xf, (0, pad), constant_values=NEG_PAD)
        tf = jnp.pad(tf, (0, pad), constant_values=0)

    x2 = xf.reshape(padded_rows, LANES)
    t2 = tf.reshape(padded_rows, LANES)

    kernel = functools.partial(_focal_partial_kernel, float(gamma),
                               int(block_rows), int(chunk_rows))

    tile_spec = pl.BlockSpec((block_rows, LANES), lambda c, i: (c * steps + i, 0))

    elems = padded_rows * LANES
    cost = pl.CostEstimate(
        flops=22 * elems,
        transcendentals=3 * elems,
        bytes_accessed=int(x2.size * x2.dtype.itemsize + t2.size * t2.dtype.itemsize
                           + num_shards * 3 * SUBLANES * LANES * 4),
    )

    partials = pl.pallas_call(
        kernel,
        out_shape=jax.ShapeDtypeStruct((num_shards * 3, SUBLANES, LANES), jnp.float32),
        grid_spec=pltpu.PrefetchScalarGridSpec(
            num_scalar_prefetch=0,
            grid=(num_shards, steps),
            in_specs=[tile_spec, tile_spec],
            out_specs=pl.BlockSpec((3, SUBLANES, LANES), lambda c, i: (c, 0, 0)),
        ),
        compiler_params=pltpu.CompilerParams(
            dimension_semantics=("parallel", "arbitrary"),
        ),
        cost_estimate=cost,
    )(x2, t2)

    # Tiny cross-lane/shard reductions + scalar combination in plain JAX.
    prt = partials.reshape(num_shards, 3, SUBLANES, LANES)
    sum_t = jnp.sum(prt[:, 0])
    s1 = jnp.sum(prt[:, 1])          # sum(t * base)
    s_all = jnp.sum(prt[:, 2])       # sum(base)
    s0 = s_all - s1                  # sum((1-t) * base)

    inv_n = jnp.float32(1.0 / n)     # 1/n computed on host in double, exact for huge n
    alpha = 1.0 - sum_t * inv_n      # == (n - sum(t)) / n
    total = alpha * s1 + (1.0 - alpha) * s0
    return total * inv_n


def _reference_focal_loss(y_pred, y_true, gamma=2.0):
    """Pure-JAX reference (mirrors torchvision sigmoid_focal_loss, mean reduction)."""
    y_pred = y_pred.astype(jnp.float32)
    y_true = y_true.astype(jnp.float32)
    n = y_pred.size
    alpha = (n - jnp.sum(y_true)) / n
    p = jax.nn.sigmoid(y_pred)
    ce = jnp.maximum(y_pred, 0.0) - y_pred * y_true + jnp.log1p(jnp.exp(-jnp.abs(y_pred)))
    p_t = p * y_true + (1 - p) * (1 - y_true)
    loss = ce * (1 - p_t) ** gamma
    alpha_t = alpha * y_true + (1 - alpha) * (1 - y_true)
    return jnp.mean(alpha_t * loss)


if __name__ == "__main__":
    key = jax.random.PRNGKey(0)
    k1, k2 = jax.random.split(key)

    # Small NCHW-like shapes: logits (f32) and binary targets (bf16 is exact for 0/1
    # and halves that input stream's HBM traffic).
    shape = (2, 4, 16, 16)
    y_pred = jax.random.normal(k1, shape, dtype=jnp.float32) * 2.0
    y_true = (jax.random.uniform(k2, shape) > 0.7).astype(jnp.bfloat16)

    out = focal_loss(y_pred, y_true, gamma=2.0)
    out = jax.block_until_ready(out)

    ref = _reference_focal_loss(y_pred, y_true, gamma=2.0)
    # approx reciprocal (EUP-only) introduces a small relative error in p -> loss.
    assert jnp.allclose(out, ref, rtol=2e-3, atol=1e-6), (out, ref)

    print("KERNEL_OK")
</pallas_src>

<mosaic_0001>
module attributes {stable_mosaic.version = 11 : i64} {
  func.func @_focal_partial_kernel(%arg0: i32, %arg1: i32, %arg2: memref<16x128xf32, #tpu.memory_space<vmem>>, %arg3: memref<16x128xbf16, #tpu.memory_space<vmem>>, %arg4: memref<3x8x128xf32, #tpu.memory_space<vmem>>) attributes {dimension_semantics = [#tpu.dimension_semantics<parallel>, #tpu.dimension_semantics<arbitrary>], iteration_bounds = array<i64: 1, 1>, scalar_prefetch = 0 : i64, scratch_operands = 0 : i64, tpu.core_type = #tpu.core_type<tc>, window_params = [{transform_indices = @transform_0, window_bounds = array<i64: 16, 128>}, {transform_indices = @transform_1, window_bounds = array<i64: 16, 128>}, {transform_indices = @transform_2, window_bounds = array<i64: 3, 8, 128>}]} {
    %cst = arith.constant 0.000000e+00 : f32
    %0 = vector.broadcast %cst : f32 to vector<8x128xf32>
    %c0_i32 = arith.constant 0 : i32
    %c16_i32 = arith.constant 16 : i32
    %1 = arith.muli %c0_i32, %c16_i32 : i32
    %2 = tpu.assume_multiple %1, 16 : i32
    %3 = arith.index_cast %2 : i32 to index
    %c0 = arith.constant 0 : index
    %4 = vector.load %arg2[%3, %c0] : memref<16x128xf32, #tpu.memory_space<vmem>>, vector<16x128xf32>
    %5 = arith.index_cast %2 : i32 to index
    %c0_0 = arith.constant 0 : index
    %6 = vector.load %arg3[%5, %c0_0] : memref<16x128xbf16, #tpu.memory_space<vmem>>, vector<16x128xbf16>
    %7 = arith.extf %6 : vector<16x128xbf16> to vector<16x128xf32>
    %8 = math.absf %4 : vector<16x128xf32>
    %cst_1 = arith.constant 0.000000e+00 : f32
    %9 = vector.broadcast %cst_1 : f32 to vector<16x128xf32>
    %10 = arith.subf %9, %8 : vector<16x128xf32>
    %11 = math.exp %10 : vector<16x128xf32>
    %cst_2 = arith.constant 0.000000e+00 : f32
    %12 = vector.broadcast %cst_2 : f32 to vector<16x128xf32>
    %13 = arith.maximumf %4, %12 : vector<16x128xf32>
    %14 = arith.mulf %4, %7 : vector<16x128xf32>
    %15 = arith.subf %13, %14 : vector<16x128xf32>
    %16 = math.log1p %11 : vector<16x128xf32>
    %17 = arith.addf %15, %16 : vector<16x128xf32>
    %cst_3 = arith.constant 1.000000e+00 : f32
    %18 = vector.broadcast %cst_3 : f32 to vector<16x128xf32>
    %19 = arith.addf %18, %11 : vector<16x128xf32>
    %20 = tpu.reciprocal %19 {approx = true} : vector<16x128xf32> -> vector<16x128xf32>
    %cst_4 = arith.constant 0.000000e+00 : f32
    %21 = vector.broadcast %cst_4 : f32 to vector<16x128xf32>
    %22 = arith.cmpf oge, %4, %21 : vector<16x128xf32>
    %23 = arith.mulf %11, %20 : vector<16x128xf32>
    %24 = arith.select %22, %20, %23 : vector<16x128xi1>, vector<16x128xf32>
    %25 = arith.mulf %24, %7 : vector<16x128xf32>
    %26 = arith.addf %24, %7 : vector<16x128xf32>
    %cst_5 = arith.constant 2.000000e+00 : f32
    %27 = vector.broadcast %cst_5 : f32 to vector<16x128xf32>
    %28 = arith.mulf %27, %25 : vector<16x128xf32>
    %29 = arith.subf %26, %28 : vector<16x128xf32>
    %30 = arith.mulf %29, %29 : vector<16x128xf32>
    %31 = arith.mulf %17, %30 : vector<16x128xf32>
    %32 = vector.shape_cast %7 : vector<16x128xf32> to vector<2x8x128xf32>
    %cst_6 = arith.constant dense<0.000000e+00> : vector<8x128xf32>
    %33 = vector.multi_reduction <add>, %32, %cst_6 [0] : vector<2x8x128xf32> to vector<8x128xf32>
    %34 = arith.addf %0, %33 : vector<8x128xf32>
    %35 = arith.mulf %7, %31 : vector<16x128xf32>
    %36 = vector.shape_cast %35 : vector<16x128xf32> to vector<2x8x128xf32>
    %cst_7 = arith.constant dense<0.000000e+00> : vector<8x128xf32>
    %37 = vector.multi_reduction <add>, %36, %cst_7 [0] : vector<2x8x128xf32> to vector<8x128xf32>
    %38 = arith.addf %0, %37 : vector<8x128xf32>
    %39 = vector.shape_cast %31 : vector<16x128xf32> to vector<2x8x128xf32>
    %cst_8 = arith.constant dense<0.000000e+00> : vector<8x128xf32>
    %40 = vector.multi_reduction <add>, %39, %cst_8 [0] : vector<2x8x128xf32> to vector<8x128xf32>
    %41 = arith.addf %0, %40 : vector<8x128xf32>
    %c1_i32 = arith.constant 1 : i32
    %c0_i32_9 = arith.constant 0 : i32
    %42 = arith.cmpi eq, %arg1, %c0_i32_9 : i32
    %43 = arith.extui %42 : i1 to i32
    %c0_i32_10 = arith.constant 0 : i32
    %44 = arith.cmpi ne, %43, %c0_i32_10 : i32
    scf.if %44 {
      %cst_27 = arith.constant 0.000000e+00 : f32
      %63 = vector.broadcast %cst_27 : f32 to vector<3x8x128xf32>
      %c0_28 = arith.constant 0 : index
      %c0_29 = arith.constant 0 : index
      %c0_30 = arith.constant 0 : index
      %64 = vector.load %arg4[%c0_28, %c0_29, %c0_30] : memref<3x8x128xf32, #tpu.memory_space<vmem>>, vector<3x8x128xf32>
      tpu.vector_store %arg4[%c0_28, %c0_29, %c0_30], %63 {strides = array<i32>} : memref<3x8x128xf32, #tpu.memory_space<vmem>>, vector<3x8x128xf32>,
    } else {
    }
    %c0_11 = arith.constant 0 : index
    %c0_12 = arith.constant 0 : index
    %c0_13 = arith.constant 0 : index
    %45 = vector.load %arg4[%c0_11, %c0_12, %c0_13] : memref<3x8x128xf32, #tpu.memory_space<vmem>>, vector<1x8x128xf32>
    %46 = vector.shape_cast %45 : vector<1x8x128xf32> to vector<8x128xf32>
    %47 = arith.addf %46, %34 : vector<8x128xf32>
    %c0_14 = arith.constant 0 : index
    %c0_15 = arith.constant 0 : index
    %c0_16 = arith.constant 0 : index
    %48 = vector.load %arg4[%c0_14, %c0_15, %c0_16] : memref<3x8x128xf32, #tpu.memory_space<vmem>>, vector<1x8x128xf32>
    %49 = vector.shape_cast %48 : vector<1x8x128xf32> to vector<8x128xf32>
    %50 = vector.shape_cast %47 : vector<8x128xf32> to vector<1x8x128xf32>
    tpu.vector_store %arg4[%c0_14, %c0_15, %c0_16], %50 {strides = array<i32>} : memref<3x8x128xf32, #tpu.memory_space<vmem>>, vector<1x8x128xf32>,
    %c1 = arith.constant 1 : index
    %c0_17 = arith.constant 0 : index
    %c0_18 = arith.constant 0 : index
    %51 = vector.load %arg4[%c1, %c0_17, %c0_18] : memref<3x8x128xf32, #tpu.memory_space<vmem>>, vector<1x8x128xf32>
    %52 = vector.shape_cast %51 : vector<1x8x128xf32> to vector<8x128xf32>
    %53 = arith.addf %52, %38 : vector<8x128xf32>
    %c1_19 = arith.constant 1 : index
    %c0_20 = arith.constant 0 : index
    %c0_21 = arith.constant 0 : index
    %54 = vector.load %arg4[%c1_19, %c0_20, %c0_21] : memref<3x8x128xf32, #tpu.memory_space<vmem>>, vector<1x8x128xf32>
    %55 = vector.shape_cast %54 : vector<1x8x128xf32> to vector<8x128xf32>
    %56 = vector.shape_cast %53 : vector<8x128xf32> to vector<1x8x128xf32>
    tpu.vector_store %arg4[%c1_19, %c0_20, %c0_21], %56 {strides = array<i32>} : memref<3x8x128xf32, #tpu.memory_space<vmem>>, vector<1x8x128xf32>,
    %c2 = arith.constant 2 : index
    %c0_22 = arith.constant 0 : index
    %c0_23 = arith.constant 0 : index
    %57 = vector.load %arg4[%c2, %c0_22, %c0_23] : memref<3x8x128xf32, #tpu.memory_space<vmem>>, vector<1x8x128xf32>
    %58 = vector.shape_cast %57 : vector<1x8x128xf32> to vector<8x128xf32>
    %59 = arith.addf %58, %41 : vector<8x128xf32>
    %c2_24 = arith.constant 2 : index
    %c0_25 = arith.constant 0 : index
    %c0_26 = arith.constant 0 : index
    %60 = vector.load %arg4[%c2_24, %c0_25, %c0_26] : memref<3x8x128xf32, #tpu.memory_space<vmem>>, vector<1x8x128xf32>
    %61 = vector.shape_cast %60 : vector<1x8x128xf32> to vector<8x128xf32>
    %62 = vector.shape_cast %59 : vector<8x128xf32> to vector<1x8x128xf32>
    tpu.vector_store %arg4[%c2_24, %c0_25, %c0_26], %62 {strides = array<i32>} : memref<3x8x128xf32, #tpu.memory_space<vmem>>, vector<1x8x128xf32>,
    return
  }
  func.func @transform_0(%arg0: i32, %arg1: i32) -> (i32, i32) {
    %c1_i32 = arith.constant 1 : i32
    %0 = arith.muli %arg0, %c1_i32 : i32
    %1 = arith.addi %0, %arg1 : i32
    %c0_i32 = arith.constant 0 : i32
    %c0_i32_0 = arith.constant 0 : i32
    return %1, %c0_i32 : i32, i32
  }
  func.func @transform_1(%arg0: i32, %arg1: i32) -> (i32, i32) {
    %c1_i32 = arith.constant 1 : i32
    %0 = arith.muli %arg0, %c1_i32 : i32
    %1 = arith.addi %0, %arg1 : i32
    %c0_i32 = arith.constant 0 : i32
    %c0_i32_0 = arith.constant 0 : i32
    return %1, %c0_i32 : i32, i32
  }
  func.func @transform_2(%arg0: i32, %arg1: i32) -> (i32, i32, i32) {
    %c0_i32 = arith.constant 0 : i32
    %c0_i32_0 = arith.constant 0 : i32
    %c0_i32_1 = arith.constant 0 : i32
    return %arg0, %c0_i32, %c0_i32_0 : i32, i32, i32
  }
}

</mosaic_0001>

<bundles_post_ra>
// kernel: tpu_custom_call.1
= control target key start
LH: loop header
LB: loop body
LE: loop exit
PB: predicated region body
PF: predicated region fallthrough
CT: control target
= control target key end

     0   :  { %7 = vsyncpa [#allocation3], 0  ;;  %s323_s0 = inlined_call_operand.hbm [shape: f32[16,128], index: 0, kind: input, shape index: {}]   ;;  %s324_s1 = inlined_call_operand.hbm [shape: bf16[16,128], index: 1, kind: input, shape index: {}]   ;;  %s325_s2 = inlined_call_operand.hbm [shape: f32[3,8,128], index: 2, kind: output, shape index: {}]  }
   0x1   :  { %8 = vsyncpa [#allocation6], 0 }
   0x2   :  { %9 = vsyncpa [#allocation4], 0  ;;  %s18_s11 = sshll.u32 %s323_s0, 4  ;;  %s266_s12 = smov [#allocation2]   ;;  %s19_s11 = int_to_ptr.hbm [resolvable:$true] %s18_s11 }
   0x3   :  { %s20_s13 = sshll.u32 %s266_s12, 4  ;;  %s35_s16 = sshll.u32 %s324_s1, 4  ;;  %s21_s13 = int_to_ptr.vmem [resolvable:$true] %s20_s13  ;;  %s36_s16 = int_to_ptr.hbm [resolvable:$true] %s35_s16 }
   0x4   :  { %s267_s17 = smov 128   ;;  %s268_s18 = smov 8  }
   0x5   :  { %26 = dma.hbm_to_vmem [thread:$0]  %s19_s11, 256, %s21_s13, [#allocation3], %s267_s17, %s267_s17, %s268_s18  }
   0x6   :  { %s269_s19 = smov [#allocation5]   ;;  %s270_s21 = smov 64  }
   0x7   :  { %s37_s20 = sshll.u32 %s269_s19, 4  ;;  %s271_s0 = smov 4   ;;  %s38_s20 = int_to_ptr.vmem [resolvable:$true] %s37_s20 }
   0x8   :  { %43 = dma.hbm_to_vmem [thread:$0]  %s36_s16, 128, %s38_s20, [#allocation6], %s270_s21, %s270_s21, %s271_s0  }
   0x9   :  { %260 = dma.done.wait [#allocation3], 256  }
   0xa   :  { %261 = vsyncadd [#allocation3], 4294967040 }
   0xb   :  { %262 = dma.done.wait [#allocation6], 128  }
   0xc   :  { %263 = vsyncadd [#allocation6], 4294967168  ;;  %v165_v0 = vld [vmem:[#allocation5] sm:$0xff]   ;;  %v56_v1 = vld [vmem:[#allocation2] sm:$0xff]  ;;  %s272_s1 = smov [#allocation7]   ;;  %s150_s25 = sshll.u32 %s325_s2, 4  ;;  %s151_s25 = int_to_ptr.hbm [resolvable:$true] %s150_s25 }
   0xd   :  { %v57_v2 = vld [vmem:[#allocation2 + $0x8] sm:$0xff]  ;;  %v297_v3 = vunpack.c.l.bf16 %v165_v0  ;;  %v299_v4 = vunpack.c.h.bf16 %v165_v0  ;;  %v62_v5 = vand.u32 2147483647, %v56_v1  ;;  %v70_v23 = vmax.f32 %v56_v1, 0.0  ;;  %s148_s22 = sshll.u32 %s272_s1, 4  ;;  %s149_s22 = int_to_ptr.vmem [resolvable:$true] %s148_s22 }
   0xe   :  { %v63_v6 = vand.u32 2147483647, %v57_v2  ;;  %v71_v26 = vmax.f32 %v57_v2, 0.0  ;;  %vm100_vm0 = vcmp.ge.f32.partialorder %v56_v1, 0.0  ;;  %vm101_vm1 = vcmp.ge.f32.partialorder %v57_v2, 0.0 }
   0xf   :  { %v118_v7 = vadd.f32 %v299_v4, %v297_v3  ;;  %v64_v8 = vsub.f32 0.0, %v62_v5  ;;  %v72_v27 = vmul.f32 %v297_v3, %v56_v1  ;;  %v73_v29 = vmul.f32 %v299_v4, %v57_v2 }
  0x10   :  { %v65_v9 = vsub.f32 0.0, %v63_v6 }
  0x11   :  { %v66_v10 = vmul.f32 1.442695, %v64_v8  ;;  %135 = vst [vmem:[#allocation7] sm:$0xff] %v118_v7  ;;  %v74_v38 = vsub.f32 %v70_v23, %v72_v27  ;;  %v75_v42 = vsub.f32 %v71_v26, %v73_v29 }
  0x12   :  { %v68_v11 = vmul.f32 1.442695, %v65_v9 }
  0x13   :  { %176 = vpow2.f32 %v66_v10 }
  0x14   :  { %178 = vpow2.f32 %v68_v11 }
  0x19   :  { %v177_v12 = vpop.eup %176 }
  0x1a   :  { %v179_v13 = vpop.eup %178  ;;  %v76_v14 = vadd.f32 1.0, %v177_v12  ;;  %v79_v16 = vmul.f32 -0.5, %v177_v12  ;;  %v82_v20 = vand.u32 2147483647, %v177_v12 }
  0x1b   :  { %v85_v15 = vadd.f32 1.0, %v179_v13  ;;  %v88_v17 = vmul.f32 -0.5, %v179_v13  ;;  %v91_v24 = vand.u32 2147483647, %v179_v13 }
  0x1c   :  { %180 = vlog2.f32 %v76_v14  ;;  %v80_v18 = vadd.f32 1.0, %v79_v16  ;;  %vm305_vm2 = vcmp.lt.f32.partialorder %v82_v20, 0.0004427343 }
  0x1d   :  { %182 = vlog2.f32 %v85_v15  ;;  %v89_v21 = vadd.f32 1.0, %v88_v17  ;;  %vm92_vm3 = vcmp.lt.f32.partialorder %v91_v24, 0.0004427343 }
  0x1e   :  { %184 = vrcp.f32 %v76_v14  ;;  %v81_v31 = vmul.f32 %v177_v12, %v80_v18 }
  0x1f   :  { %186 = vrcp.f32 %v85_v15  ;;  %v90_v35 = vmul.f32 %v179_v13, %v89_v21 }
  0x22   :  { %v181_v19 = vpop.eup %180 }
  0x23   :  { %v183_v22 = vpop.eup %182  ;;  %v78_v30 = vmul.f32 0.6931472, %v181_v19 }
  0x24   :  { %v185_v25 = vpop.eup %184  ;;  %v87_v34 = vmul.f32 0.6931472, %v183_v22 }
  0x25   :  { %v187_v28 = vpop.eup %186  ;;  %v102_v32 = vmul.f32 %v185_v25, %v177_v12  ;;  %v84_v43 = vsel %vm305_vm2, %v81_v31, %v78_v30 }
  0x26   :  { %v103_v36 = vmul.f32 %v187_v28, %v179_v13  ;;  %v93_v46 = vsel %vm92_vm3, %v90_v35, %v87_v34  ;;  %v94_v49 = vadd.f32 %v84_v43, %v74_v38 }
  0x27   :  { %v104_v37 = vsel %vm100_vm0, %v185_v25, %v102_v32  ;;  %v95_v51 = vadd.f32 %v93_v46, %v75_v42 }
  0x28   :  { %v105_v39 = vsel %vm101_vm1, %v187_v28, %v103_v36  ;;  %v106_v40 = vmul.f32 %v297_v3, %v104_v37  ;;  %v108_v41 = vadd.f32 %v297_v3, %v104_v37 }
  0x29   :  { %v107_v44 = vmul.f32 %v299_v4, %v105_v39  ;;  %v109_v45 = vadd.f32 %v299_v4, %v105_v39 }
  0x2a   :  { %v110_v47 = vmul.f32 2.0, %v106_v40 }
  0x2b   :  { %v111_v48 = vmul.f32 2.0, %v107_v44 }
  0x2c   :  { %v112_v50 = vsub.f32 %v108_v41, %v110_v47 }
  0x2d   :  { %v113_v52 = vsub.f32 %v109_v45, %v111_v48 }
  0x2e   :  { %v114_v53 = vmul.f32 %v112_v50, %v112_v50 }
  0x2f   :  { %v115_v54 = vmul.f32 %v113_v52, %v113_v52 }
  0x30   :  { %v116_v55 = vmul.f32 %v114_v53, %v94_v49 }
  0x31   :  { %v117_v56 = vmul.f32 %v115_v54, %v95_v51 }
  0x32   :  { %v120_v57 = vmul.f32 %v297_v3, %v116_v55 }
  0x33   :  { %v121_v58 = vmul.f32 %v299_v4, %v117_v56  ;;  %v124_v59 = vadd.f32 %v117_v56, %v116_v55 }
  0x35   :  { %v122_v60 = vadd.f32 %v121_v58, %v120_v57  ;;  %143 = vst [vmem:[#allocation7 + $0x10] sm:$0xff] %v124_v59 }
  0x37   :  { %139 = vst [vmem:[#allocation7 + $0x8] sm:$0xff] %v122_v60 }
  0x38   :  { %156 = dma.vmem_to_hbm [thread:$0]  %s149_s22, 384, %s151_s25, [#allocation4], %s267_s17, %s267_s17, %s268_s18  }
  0x39   :  { %264 = dma.done.wait [#allocation4], 384  }
  0x3a   :  { %265 = vsyncadd [#allocation4], 4294966912 }
  0x3b   :  { %161 = vsyncpa [#allocation3], 1 }
  0x3c   :  { %162 = vsyncpa [#allocation6], 1 }
  0x3d   :  { %163 = vsyncpa [#allocation4], 1 }

</bundles_post_ra>
